<compile_context>
chip_gen: v5e
topology: v5e:2x2
jax: 0.10.0
libtpu: 0.0.40
codegen_flags: <defaults>
</compile_context>

<pallas_src>
import numpy as np
import jax
import jax.numpy as jnp
from jax.experimental import pallas as pl
from jax.experimental.pallas import tpu as pltpu


# ----------------------------------------------------------------------------
# Pallas kernel: for one cutout k and a block of Bblk images compute
#   out[k, b] = Wy[k] @ img[b] @ Wx[k]^T
# ----------------------------------------------------------------------------
def _cutout_kernel(img_ref, wy_ref, wxt_ref, out_ref):
    """
    img_ref : (Bblk, H, W)        compute dtype; k-invariant (resident in VMEM)
    wy_ref  : (1, S, H)           compute dtype; per-cutout row-pool matrix
    wxt_ref : (1, W, S_pad)       compute dtype; per-cutout col-pool matrix,
                                  pre-transposed and lane-padded (S_pad % 128 == 0)
    out_ref : (1, Bblk, S, S_pad) float32
    """
    bblk, h, w = img_ref.shape
    s_pad = wxt_ref.shape[2]

    wy = wy_ref[0]           # (S, H)
    wxt = wxt_ref[0]         # (W, S_pad)

    # Stage 1 -- one fat MXU matmul: pool along x for every row of every image
    # in the block at once.  M = Bblk*H, K = W, N = S_pad (lane aligned).
    r = jnp.dot(img_ref[...].reshape(bblk * h, w), wxt,
                preferred_element_type=jnp.float32)          # (Bblk*H, S_pad)
    r = r.astype(wy.dtype).reshape(bblk, h, s_pad)

    # Stage 2 -- pool along y: one (S, H) @ (H, S_pad) matmul per image,
    # statically unrolled; each result is a full aligned (S, S_pad) store.
    for b in range(bblk):
        out_ref[0, b] = jnp.dot(wy, r[b],
                                preferred_element_type=jnp.float32
                                ).astype(out_ref.dtype)


# ----------------------------------------------------------------------------
# Host-side helpers
# ----------------------------------------------------------------------------
def _pooling_matrix(side, offset, size, cut_size):
    """Exact adaptive-avg-pool averaging matrix for one axis of one cutout.

    W[i, offset + y] = 1/(end_i - start_i) for y in [start_i, end_i), with
    start_i = floor(i*size/S), end_i = ceil((i+1)*size/S)  (PyTorch semantics).
    """
    m = np.zeros((cut_size, side), dtype=np.float32)
    for i in range(cut_size):
        start = (i * size) // cut_size
        end = -((-(i + 1) * size) // cut_size)  # ceil division
        m[i, offset + start: offset + end] = 1.0 / float(end - start)
    return m


def _round_up(x, mult):
    return ((x + mult - 1) // mult) * mult


def _pick_block_batch(nb, h, w, s, s_pad, itemsize, budget=6 << 20):
    """Largest divisor of nb whose VMEM footprint stays under `budget`."""
    def cost(bblk):
        img = bblk * h * w * itemsize * 2            # double-buffered input block
        inter = bblk * h * s_pad * (4 + itemsize)    # stage-1 result + cast
        out = bblk * s * s_pad * 4 * 2               # double-buffered output block
        return img + inter + out
    best = 1
    for bblk in range(1, nb + 1):
        if nb % bblk == 0 and cost(bblk) <= budget:
            best = bblk
    return best


def _adaptive_avg_pool_np(a, s):
    """Reference adaptive_avg_pool2d in numpy (float64). a: (N, C, h, w)."""
    n_, c_, h, w = a.shape
    out = np.zeros((n_, c_, s, s), dtype=np.float64)
    for i in range(s):
        ys, ye = (i * h) // s, -((-(i + 1) * h) // s)
        for j in range(s):
            xs, xe = (j * w) // s, -((-(j + 1) * w) // s)
            out[:, :, i, j] = a[:, :, ys:ye, xs:xe].mean(axis=(2, 3))
    return out


# ----------------------------------------------------------------------------
# Module wrapper
# ----------------------------------------------------------------------------
class MakeCutoutsPallas:
    def __init__(self, cut_size, cutn, cut_pow=1.0, seed=0,
                 compute_dtype=jnp.bfloat16):
        self.cut_size = cut_size
        self.cutn = cutn
        self.cut_pow = cut_pow
        self.compute_dtype = compute_dtype
        # Deterministic replacement for torch.rand / torch.randint.
        self._rng = np.random.default_rng(seed)

    def __call__(self, x):
        # x: (N, C, H, W), NCHW like the PyTorch module.
        N, C, H, W = x.shape
        S = self.cut_size
        S_pad = _round_up(S, 128)      # lane-dense output / matmul N dim
        NB = N * C

        # --- host-side: draw random crops, build exact pooling matrices -----
        # TODO(synk): if called every training step, cache this build / move it
        # on-device (it is tiny but serializes ahead of the kernel).
        max_size = min(H, W)
        min_size = min(H, W, S)
        wy_list, wxt_list, params = [], [], []
        for _ in range(self.cutn):
            size = int(self._rng.random() ** self.cut_pow
                       * (max_size - min_size) + min_size)
            offsetx = int(self._rng.integers(0, W - size + 1))
            offsety = int(self._rng.integers(0, H - size + 1))
            wy_list.append(_pooling_matrix(H, offsety, size, S))
            wx = _pooling_matrix(W, offsetx, size, S)        # (S, W)
            wxt = np.zeros((W, S_pad), dtype=np.float32)
            wxt[:, :S] = wx.T                                # pre-transposed + pad
            wxt_list.append(wxt)
            params.append((size, offsety, offsetx))

        cdt = self.compute_dtype
        itemsize = np.dtype(cdt).itemsize
        wy = jnp.asarray(np.stack(wy_list), dtype=cdt)       # (cutn, S, H)
        wxt = jnp.asarray(np.stack(wxt_list), dtype=cdt)     # (cutn, W, S_pad)
        img = jnp.asarray(x, dtype=cdt).reshape(NB, H, W)    # (NB, H, W)

        bblk = _pick_block_batch(NB, H, W, S, S_pad, itemsize)

        out = pl.pallas_call(
            _cutout_kernel,
            out_shape=jax.ShapeDtypeStruct((self.cutn, NB, S, S_pad),
                                           jnp.float32),
            # bb is the OUTER grid axis, k the inner one: the image block index
            # is constant over the whole inner cutout loop, so it is fetched
            # from HBM once per bb block instead of once per (k, b).
            grid=(NB // bblk, self.cutn),
            in_specs=[
                pl.BlockSpec((bblk, H, W), lambda bb, k: (bb, 0, 0)),
                pl.BlockSpec((1, S, H), lambda bb, k: (k, 0, 0)),
                pl.BlockSpec((1, W, S_pad), lambda bb, k: (k, 0, 0)),
            ],
            out_specs=pl.BlockSpec((1, bblk, S, S_pad),
                                   lambda bb, k: (k, bb, 0, 0)),
            compiler_params=pltpu.CompilerParams(
                dimension_semantics=("parallel", "parallel")),
        )(img, wy, wxt)

        # Strip lane padding, then match torch.cat(dim=0) layout:
        # (cutn, N*C, S, S) -> (cutn, N, C, S, S) -> (cutn*N, C, S, S)
        out = out[..., :S]
        out = out.reshape(self.cutn, N, C, S, S).reshape(self.cutn * N, C, S, S)
        out = out.astype(x.dtype)

        # stash for the reference checks
        self._last_wy, self._last_wxt, self._last_params = wy, wxt, params
        return out


if __name__ == "__main__":
    # Small shapes consistent with the module's forward.
    N, C, H, W = 2, 4, 16, 16
    cut_size, cutn, cut_pow = 8, 4, 1.0

    key = jax.random.PRNGKey(0)
    x = jax.random.normal(key, (N, C, H, W), dtype=jnp.float32)

    mc = MakeCutoutsPallas(cut_size, cutn, cut_pow, seed=0)
    out = jax.block_until_ready(mc(x))
    assert out.shape == (cutn * N, C, cut_size, cut_size), out.shape

    # Reference 1: true adaptive_avg_pool2d semantics (numpy, f64) on the same
    # random crops; loose tolerance covers bf16 compute.
    xn = np.asarray(x, dtype=np.float64)
    refs = []
    for (size, oy, ox) in mc._last_params:
        crop = xn[:, :, oy:oy + size, ox:ox + size]
        refs.append(_adaptive_avg_pool_np(crop, cut_size))
    ref = np.concatenate(refs, axis=0)
    np.testing.assert_allclose(np.asarray(out, dtype=np.float64), ref,
                               atol=5e-2, rtol=5e-2)

    # Reference 2: same staged-precision bilinear math in plain JAX (tight).
    cdt = mc.compute_dtype
    imgc = jnp.asarray(x, dtype=cdt).reshape(N * C, H, W).astype(jnp.float32)
    wyc = mc._last_wy.astype(jnp.float32)
    wxtc = mc._last_wxt.astype(jnp.float32)
    r = jnp.einsum("bhw,kwt->kbht", imgc, wxtc).astype(cdt).astype(jnp.float32)
    ref2 = jnp.einsum("ksh,kbht->kbst", wyc, r)[..., :cut_size]
    ref2 = ref2.reshape(cutn, N, C, cut_size, cut_size).reshape(
        cutn * N, C, cut_size, cut_size)
    np.testing.assert_allclose(np.asarray(out), np.asarray(ref2),
                               atol=1e-2, rtol=1e-2)

    print("KERNEL_OK")
</pallas_src>

<mosaic_0001>
module attributes {stable_mosaic.version = 11 : i64} {
  func.func @_cutout_kernel(%arg0: i32, %arg1: i32, %arg2: memref<8x16x16xbf16, #tpu.memory_space<vmem>>, %arg3: memref<1x8x16xbf16, #tpu.memory_space<vmem>>, %arg4: memref<1x16x128xbf16, #tpu.memory_space<vmem>>, %arg5: memref<1x8x8x128xf32, #tpu.memory_space<vmem>>) attributes {dimension_semantics = [#tpu.dimension_semantics<parallel>, #tpu.dimension_semantics<parallel>], iteration_bounds = array<i64: 1, 4>, scalar_prefetch = 0 : i64, scratch_operands = 0 : i64, tpu.core_type = #tpu.core_type<tc>, window_params = [{transform_indices = @transform_0, window_bounds = array<i64: 8, 16, 16>}, {transform_indices = @transform_1, window_bounds = array<i64: 1, 8, 16>}, {transform_indices = @transform_2, window_bounds = array<i64: 1, 16, 128>}, {transform_indices = @transform_3, window_bounds = array<i64: 1, 8, 8, 128>}]} {
    %c0 = arith.constant 0 : index
    %c0_0 = arith.constant 0 : index
    %c0_1 = arith.constant 0 : index
    %0 = vector.load %arg3[%c0, %c0_0, %c0_1] : memref<1x8x16xbf16, #tpu.memory_space<vmem>>, vector<1x8x16xbf16>
    %1 = vector.shape_cast %0 : vector<1x8x16xbf16> to vector<8x16xbf16>
    %c0_2 = arith.constant 0 : index
    %c0_3 = arith.constant 0 : index
    %c0_4 = arith.constant 0 : index
    %2 = vector.load %arg4[%c0_2, %c0_3, %c0_4] : memref<1x16x128xbf16, #tpu.memory_space<vmem>>, vector<1x16x128xbf16>
    %3 = vector.shape_cast %2 : vector<1x16x128xbf16> to vector<16x128xbf16>
    %c0_5 = arith.constant 0 : index
    %c0_6 = arith.constant 0 : index
    %c0_7 = arith.constant 0 : index
    %4 = vector.load %arg2[%c0_5, %c0_6, %c0_7] : memref<8x16x16xbf16, #tpu.memory_space<vmem>>, vector<8x16x16xbf16>
    %5 = vector.shape_cast %4 : vector<8x16x16xbf16> to vector<128x16xbf16>
    %cst = arith.constant dense<0.000000e+00> : vector<128x128xf32>
    %6 = tpu.matmul %5, %3, %cst {dimension_numbers = #tpu.dot_dimension_numbers<[1], [0], [0], [1], [0, 0, 1, 1], [], []>} : vector<128x16xbf16>, vector<16x128xbf16>, vector<128x128xf32> -> vector<128x128xf32>
    %7 = arith.truncf %6 : vector<128x128xf32> to vector<128x128xbf16>
    %8 = vector.shape_cast %7 : vector<128x128xbf16> to vector<8x16x128xbf16>
    %9 = vector.extract_strided_slice %8 {offsets = [0, 0, 0], sizes = [1, 16, 128], strides = [1, 1, 1]} : vector<8x16x128xbf16> to vector<1x16x128xbf16>
    %10 = vector.shape_cast %9 : vector<1x16x128xbf16> to vector<16x128xbf16>
    %cst_8 = arith.constant dense<0.000000e+00> : vector<8x128xf32>
    %11 = tpu.matmul %1, %10, %cst_8 {dimension_numbers = #tpu.dot_dimension_numbers<[1], [0], [0], [1], [0, 0, 1, 1], [], []>} : vector<8x16xbf16>, vector<16x128xbf16>, vector<8x128xf32> -> vector<8x128xf32>
    %c0_9 = arith.constant 0 : index
    %c0_10 = arith.constant 0 : index
    %c0_11 = arith.constant 0 : index
    %c0_12 = arith.constant 0 : index
    %12 = vector.load %arg5[%c0_9, %c0_10, %c0_11, %c0_12] : memref<1x8x8x128xf32, #tpu.memory_space<vmem>>, vector<1x1x8x128xf32>
    %13 = vector.shape_cast %12 : vector<1x1x8x128xf32> to vector<8x128xf32>
    %14 = vector.shape_cast %11 : vector<8x128xf32> to vector<1x1x8x128xf32>
    tpu.vector_store %arg5[%c0_9, %c0_10, %c0_11, %c0_12], %14 {strides = array<i32>} : memref<1x8x8x128xf32, #tpu.memory_space<vmem>>, vector<1x1x8x128xf32>,
    %15 = vector.extract_strided_slice %8 {offsets = [1, 0, 0], sizes = [1, 16, 128], strides = [1, 1, 1]} : vector<8x16x128xbf16> to vector<1x16x128xbf16>
    %16 = vector.shape_cast %15 : vector<1x16x128xbf16> to vector<16x128xbf16>
    %cst_13 = arith.constant dense<0.000000e+00> : vector<8x128xf32>
    %17 = tpu.matmul %1, %16, %cst_13 {dimension_numbers = #tpu.dot_dimension_numbers<[1], [0], [0], [1], [0, 0, 1, 1], [], []>} : vector<8x16xbf16>, vector<16x128xbf16>, vector<8x128xf32> -> vector<8x128xf32>
    %c0_14 = arith.constant 0 : index
    %c1 = arith.constant 1 : index
    %c0_15 = arith.constant 0 : index
    %c0_16 = arith.constant 0 : index
    %18 = vector.load %arg5[%c0_14, %c1, %c0_15, %c0_16] : memref<1x8x8x128xf32, #tpu.memory_space<vmem>>, vector<1x1x8x128xf32>
    %19 = vector.shape_cast %18 : vector<1x1x8x128xf32> to vector<8x128xf32>
    %20 = vector.shape_cast %17 : vector<8x128xf32> to vector<1x1x8x128xf32>
    tpu.vector_store %arg5[%c0_14, %c1, %c0_15, %c0_16], %20 {strides = array<i32>} : memref<1x8x8x128xf32, #tpu.memory_space<vmem>>, vector<1x1x8x128xf32>,
    %21 = vector.extract_strided_slice %8 {offsets = [2, 0, 0], sizes = [1, 16, 128], strides = [1, 1, 1]} : vector<8x16x128xbf16> to vector<1x16x128xbf16>
    %22 = vector.shape_cast %21 : vector<1x16x128xbf16> to vector<16x128xbf16>
    %cst_17 = arith.constant dense<0.000000e+00> : vector<8x128xf32>
    %23 = tpu.matmul %1, %22, %cst_17 {dimension_numbers = #tpu.dot_dimension_numbers<[1], [0], [0], [1], [0, 0, 1, 1], [], []>} : vector<8x16xbf16>, vector<16x128xbf16>, vector<8x128xf32> -> vector<8x128xf32>
    %c0_18 = arith.constant 0 : index
    %c2 = arith.constant 2 : index
    %c0_19 = arith.constant 0 : index
    %c0_20 = arith.constant 0 : index
    %24 = vector.load %arg5[%c0_18, %c2, %c0_19, %c0_20] : memref<1x8x8x128xf32, #tpu.memory_space<vmem>>, vector<1x1x8x128xf32>
    %25 = vector.shape_cast %24 : vector<1x1x8x128xf32> to vector<8x128xf32>
    %26 = vector.shape_cast %23 : vector<8x128xf32> to vector<1x1x8x128xf32>
    tpu.vector_store %arg5[%c0_18, %c2, %c0_19, %c0_20], %26 {strides = array<i32>} : memref<1x8x8x128xf32, #tpu.memory_space<vmem>>, vector<1x1x8x128xf32>,
    %27 = vector.extract_strided_slice %8 {offsets = [3, 0, 0], sizes = [1, 16, 128], strides = [1, 1, 1]} : vector<8x16x128xbf16> to vector<1x16x128xbf16>
    %28 = vector.shape_cast %27 : vector<1x16x128xbf16> to vector<16x128xbf16>
    %cst_21 = arith.constant dense<0.000000e+00> : vector<8x128xf32>
    %29 = tpu.matmul %1, %28, %cst_21 {dimension_numbers = #tpu.dot_dimension_numbers<[1], [0], [0], [1], [0, 0, 1, 1], [], []>} : vector<8x16xbf16>, vector<16x128xbf16>, vector<8x128xf32> -> vector<8x128xf32>
    %c0_22 = arith.constant 0 : index
    %c3 = arith.constant 3 : index
    %c0_23 = arith.constant 0 : index
    %c0_24 = arith.constant 0 : index
    %30 = vector.load %arg5[%c0_22, %c3, %c0_23, %c0_24] : memref<1x8x8x128xf32, #tpu.memory_space<vmem>>, vector<1x1x8x128xf32>
    %31 = vector.shape_cast %30 : vector<1x1x8x128xf32> to vector<8x128xf32>
    %32 = vector.shape_cast %29 : vector<8x128xf32> to vector<1x1x8x128xf32>
    tpu.vector_store %arg5[%c0_22, %c3, %c0_23, %c0_24], %32 {strides = array<i32>} : memref<1x8x8x128xf32, #tpu.memory_space<vmem>>, vector<1x1x8x128xf32>,
    %33 = vector.extract_strided_slice %8 {offsets = [4, 0, 0], sizes = [1, 16, 128], strides = [1, 1, 1]} : vector<8x16x128xbf16> to vector<1x16x128xbf16>
    %34 = vector.shape_cast %33 : vector<1x16x128xbf16> to vector<16x128xbf16>
    %cst_25 = arith.constant dense<0.000000e+00> : vector<8x128xf32>
    %35 = tpu.matmul %1, %34, %cst_25 {dimension_numbers = #tpu.dot_dimension_numbers<[1], [0], [0], [1], [0, 0, 1, 1], [], []>} : vector<8x16xbf16>, vector<16x128xbf16>, vector<8x128xf32> -> vector<8x128xf32>
    %c0_26 = arith.constant 0 : index
    %c4 = arith.constant 4 : index
    %c0_27 = arith.constant 0 : index
    %c0_28 = arith.constant 0 : index
    %36 = vector.load %arg5[%c0_26, %c4, %c0_27, %c0_28] : memref<1x8x8x128xf32, #tpu.memory_space<vmem>>, vector<1x1x8x128xf32>
    %37 = vector.shape_cast %36 : vector<1x1x8x128xf32> to vector<8x128xf32>
    %38 = vector.shape_cast %35 : vector<8x128xf32> to vector<1x1x8x128xf32>
    tpu.vector_store %arg5[%c0_26, %c4, %c0_27, %c0_28], %38 {strides = array<i32>} : memref<1x8x8x128xf32, #tpu.memory_space<vmem>>, vector<1x1x8x128xf32>,
    %39 = vector.extract_strided_slice %8 {offsets = [5, 0, 0], sizes = [1, 16, 128], strides = [1, 1, 1]} : vector<8x16x128xbf16> to vector<1x16x128xbf16>
    %40 = vector.shape_cast %39 : vector<1x16x128xbf16> to vector<16x128xbf16>
    %cst_29 = arith.constant dense<0.000000e+00> : vector<8x128xf32>
    %41 = tpu.matmul %1, %40, %cst_29 {dimension_numbers = #tpu.dot_dimension_numbers<[1], [0], [0], [1], [0, 0, 1, 1], [], []>} : vector<8x16xbf16>, vector<16x128xbf16>, vector<8x128xf32> -> vector<8x128xf32>
    %c0_30 = arith.constant 0 : index
    %c5 = arith.constant 5 : index
    %c0_31 = arith.constant 0 : index
    %c0_32 = arith.constant 0 : index
    %42 = vector.load %arg5[%c0_30, %c5, %c0_31, %c0_32] : memref<1x8x8x128xf32, #tpu.memory_space<vmem>>, vector<1x1x8x128xf32>
    %43 = vector.shape_cast %42 : vector<1x1x8x128xf32> to vector<8x128xf32>
    %44 = vector.shape_cast %41 : vector<8x128xf32> to vector<1x1x8x128xf32>
    tpu.vector_store %arg5[%c0_30, %c5, %c0_31, %c0_32], %44 {strides = array<i32>} : memref<1x8x8x128xf32, #tpu.memory_space<vmem>>, vector<1x1x8x128xf32>,
    %45 = vector.extract_strided_slice %8 {offsets = [6, 0, 0], sizes = [1, 16, 128], strides = [1, 1, 1]} : vector<8x16x128xbf16> to vector<1x16x128xbf16>
    %46 = vector.shape_cast %45 : vector<1x16x128xbf16> to vector<16x128xbf16>
    %cst_33 = arith.constant dense<0.000000e+00> : vector<8x128xf32>
    %47 = tpu.matmul %1, %46, %cst_33 {dimension_numbers = #tpu.dot_dimension_numbers<[1], [0], [0], [1], [0, 0, 1, 1], [], []>} : vector<8x16xbf16>, vector<16x128xbf16>, vector<8x128xf32> -> vector<8x128xf32>
    %c0_34 = arith.constant 0 : index
    %c6 = arith.constant 6 : index
    %c0_35 = arith.constant 0 : index
    %c0_36 = arith.constant 0 : index
    %48 = vector.load %arg5[%c0_34, %c6, %c0_35, %c0_36] : memref<1x8x8x128xf32, #tpu.memory_space<vmem>>, vector<1x1x8x128xf32>
    %49 = vector.shape_cast %48 : vector<1x1x8x128xf32> to vector<8x128xf32>
    %50 = vector.shape_cast %47 : vector<8x128xf32> to vector<1x1x8x128xf32>
    tpu.vector_store %arg5[%c0_34, %c6, %c0_35, %c0_36], %50 {strides = array<i32>} : memref<1x8x8x128xf32, #tpu.memory_space<vmem>>, vector<1x1x8x128xf32>,
    %51 = vector.extract_strided_slice %8 {offsets = [7, 0, 0], sizes = [1, 16, 128], strides = [1, 1, 1]} : vector<8x16x128xbf16> to vector<1x16x128xbf16>
    %52 = vector.shape_cast %51 : vector<1x16x128xbf16> to vector<16x128xbf16>
    %cst_37 = arith.constant dense<0.000000e+00> : vector<8x128xf32>
    %53 = tpu.matmul %1, %52, %cst_37 {dimension_numbers = #tpu.dot_dimension_numbers<[1], [0], [0], [1], [0, 0, 1, 1], [], []>} : vector<8x16xbf16>, vector<16x128xbf16>, vector<8x128xf32> -> vector<8x128xf32>
    %c0_38 = arith.constant 0 : index
    %c7 = arith.constant 7 : index
    %c0_39 = arith.constant 0 : index
    %c0_40 = arith.constant 0 : index
    %54 = vector.load %arg5[%c0_38, %c7, %c0_39, %c0_40] : memref<1x8x8x128xf32, #tpu.memory_space<vmem>>, vector<1x1x8x128xf32>
    %55 = vector.shape_cast %54 : vector<1x1x8x128xf32> to vector<8x128xf32>
    %56 = vector.shape_cast %53 : vector<8x128xf32> to vector<1x1x8x128xf32>
    tpu.vector_store %arg5[%c0_38, %c7, %c0_39, %c0_40], %56 {strides = array<i32>} : memref<1x8x8x128xf32, #tpu.memory_space<vmem>>, vector<1x1x8x128xf32>,
    return
  }
  func.func @transform_0(%arg0: i32, %arg1: i32) -> (i32, i32, i32) {
    %c0_i32 = arith.constant 0 : i32
    %c0_i32_0 = arith.constant 0 : i32
    %c0_i32_1 = arith.constant 0 : i32
    return %arg0, %c0_i32, %c0_i32_0 : i32, i32, i32
  }
  func.func @transform_1(%arg0: i32, %arg1: i32) -> (i32, i32, i32) {
    %c0_i32 = arith.constant 0 : i32
    %c0_i32_0 = arith.constant 0 : i32
    %c0_i32_1 = arith.constant 0 : i32
    return %arg1, %c0_i32, %c0_i32_0 : i32, i32, i32
  }
  func.func @transform_2(%arg0: i32, %arg1: i32) -> (i32, i32, i32) {
    %c0_i32 = arith.constant 0 : i32
    %c0_i32_0 = arith.constant 0 : i32
    %c0_i32_1 = arith.constant 0 : i32
    return %arg1, %c0_i32, %c0_i32_0 : i32, i32, i32
  }
  func.func @transform_3(%arg0: i32, %arg1: i32) -> (i32, i32, i32, i32) {
    %c0_i32 = arith.constant 0 : i32
    %c0_i32_0 = arith.constant 0 : i32
    %c0_i32_1 = arith.constant 0 : i32
    return %arg1, %arg0, %c0_i32, %c0_i32_0 : i32, i32, i32, i32
  }
}

</mosaic_0001>

<bundles_post_ra>
// kernel: tpu_custom_call.1
= control target key start
LH: loop header
LB: loop body
LE: loop exit
PB: predicated region body
PF: predicated region fallthrough
CT: control target
= control target key end

     0   :  { %8 = vsyncpa [#allocation3], 0  ;;  %s1290_s0 = inlined_call_operand.hbm [shape: bf16[8,16,16], index: 0, kind: input, shape index: {}]   ;;  %s1291_s1 = inlined_call_operand.hbm [shape: bf16[4,8,16], index: 1, kind: input, shape index: {}]   ;;  %s1292_s2 = inlined_call_operand.hbm [shape: bf16[4,16,128], index: 2, kind: input, shape index: {}]   ;;  %s1293_s3 = inlined_call_operand.hbm [shape: f32[4,8,8,128], index: 3, kind: output, shape index: {}]  }
   0x1   :  { %9 = vsyncpa [#allocation6], 0 }
   0x2   :  { %11 = vsyncpa [#allocation6 + $0x1], 0 }
   0x3   :  { %12 = vsyncpa [#allocation4], 0 }
   0x4   :  { %14 = vsyncpa [#allocation4 + $0x1], 0  ;;  %s1109_s12 = smov 0   ;;  %s1111_s13 = smov 0  }
   0x5   :  { %s1113_s14 = smov 0   ;;  %s1115_s15 = smov 0  }
   0x6   :  { %s1117_s16 = smov 0   ;;  %s1119_s17 = smov 0  }
   0x7 LB: > { %s1140_s18 = sadd.s32 4294967295, %s1082_s17   ;;  %s732_s19 = sadd.s32 4294967294, %s1082_s17   ;;  %s1082_s17 = sphi %s1119_s17, %s20_s17   ;;  %s1078_s16 = sphi %s1117_s16, %s1304_s16   ;;  %s1074_s15 = sphi %s1115_s15, %s1303_s15   ;;  %s1070_s14 = sphi %s1113_s14, %s1302_s14   ;;  %s1066_s13 = sphi %s1111_s13, %s1301_s13   ;;  %s1062_s12 = sphi %s1109_s12, %s1300_s12  }
   0x8   : > { %s29_s20 = sadd.s32 1, %s1078_s16  ;;  %s65_s21 = sadd.s32 1, %s1070_s14 }
   0x9   : > { %p30_p0 = scmp.ge.s32.totalorder %s29_s20, 4  ;;  %p72_p1 = scmp.ne.s32.totalorder %s1070_s14, %s1066_s13 }
   0xa   : > { %p73_p2 = scmp.eq.s32.totalorder %s1082_s17, 0  ;;  %p78_p3 = scmp.ne.s32.totalorder %s1066_s13, %s1062_s12 }
   0xb   : > { %s1306_s20 = smov (%p30_p0, %s29_s20), 0  ;;  %p130_p5 = scmp.eq.s32.totalorder %s1140_s18, 3 }
   0xc   : > { %p1152_p4 = por %p73_p2, %p72_p1  ;;  %s62_s23 = ssub.s32 %s1078_s16, %s1306_s20 }
   0xd   : > { %p136_p6 = scmp.eq.s32.totalorder %s732_s19, 3  ;;  %p63_p7 = scmp.eq.s32.totalorder %s62_s23, 0 }
   0xe   : > { %p1159_p8 = por %p130_p5, %p72_p1  ;;  %p850_p10 = scmp.lt.s32.totalorder %s1082_s17, 4 }
   0xf   : > { %p1166_p9 = por %p136_p6, %p78_p3  ;;  %s174_s27 = sand.u32 1, %s1082_s17  }
  0x10   : > { %s1171_s26 = scalar_select %p63_p7, %s1070_s14, %s65_s21  }
  0x11   : > { %s176_s28 = sand.u32 1, %s1070_s14   ;;  %s737_s30 = sshll.u32 %s1078_s16, 2 }
  0x12   : > { %s736_s29 = sshll.u32 %s176_s28, 2  ;;  %s182_s6 = scalar_lea.hbm %s1291_s1, %s737_s30 }
  0x13   : > { %s178_s7 = scalar_lea.vmem [#allocation5], %s736_s29  ;;  %s184_s9 = sshll.u32 %s182_s6, 4  ;;  %s185_s9 = int_to_ptr.hbm [resolvable:$true] %s184_s9 }
  0x14   : > { %s186_s8 = sshll.u32 %s178_s7, 4  ;;  %p1182_p11 = pnand %p850_p10, %p1152_p4  ;;  %s187_s8 = int_to_ptr.vmem [resolvable:$true] %s186_s8 }
  0x15   : > { %s738_s11 = sshll.u32 %s176_s28, 3  ;;  %s175_s19 = scalar_lea.sflag [#allocation6], %s174_s27 }
  0x16   : > { %841 = dma.hbm_to_vmem [thread:$0]  (!%p1182_p11), %s185_s9, 64, %s187_s8, %s175_s19  }
  0x17   : > { %s810_s21 = sshll.u32 %s1078_s16, 3  ;;  %s197_s23 = scalar_lea.vmem [#allocation7], %s738_s11 }
  0x18   : > { %s205_s29 = sshll.u32 %s197_s23, 4  ;;  %p79_p12 = scmp.eq.s32.totalorder %s1140_s18, 0  ;;  %s206_s29 = int_to_ptr.vmem [resolvable:$true] %s205_s29 }
  0x19   : > { %p733_p13 = scmp.ge.s32.totalorder %s1082_s17, 1  ;;  %p143_p0 = scmp.lt.s32.totalorder %s1082_s17, 5 }
  0x1a   : > { %s158_s22 = sshll.u32 %s1290_s0, 4  ;;  %p1200_p1 = por %p79_p12, %p78_p3  ;;  %s159_s22 = int_to_ptr.hbm [resolvable:$true] %s158_s22 }
  0x1b   : > { %p1204_p2 = pnand %p733_p13, %p143_p0  ;;  %s1084_s28 = smov [#allocation2]  }
  0x1c   : > { %s160_s6 = sshll.u32 %s1084_s28, 4  ;;  %s202_s9 = scalar_lea.hbm %s1292_s2, %s810_s21  ;;  %s161_s6 = int_to_ptr.vmem [resolvable:$true] %s160_s6 }
  0x1d   : > { %p834_p4 = pneg %p1204_p2  ;;  %s203_s11 = sshll.u32 %s202_s9, 4  ;;  %s204_s11 = int_to_ptr.hbm [resolvable:$true] %s203_s11 }
  0x1e   : > { %s1085_s23 = smov 64   ;;  %s1086_s30 = smov 4  }
  0x1f   : > { %p835_p3 = pnand %p834_p4, %p79_p12  ;;  %217 = sbr.rel (%p1204_p2) target bundleno = 388 (0x184), region = 32 }
  0x20   : > { %844 = dma.hbm_to_vmem [thread:$0]  (!%p1182_p11), %s204_s11, 128, %s206_s29, %s175_s19, %s1085_s23, %s1085_s23, %s1086_s30  }
  0x21   : > { %837 = dma.hbm_to_vmem [thread:$0]  (!%p835_p3), %s159_s22, 1024, %s161_s6, [#allocation3], %s1085_s23, %s1085_s23, %s1086_s30  }
  0x24   : > { %1049 = dma.done.wait (%p79_p12), [#allocation3], 1024  }
  0x25   : > { %1051 = vsyncadd (%p79_p12), [#allocation3], 4294966272  ;;  %s224_s21 = sand.u32 1, %s1140_s18   ;;  %s1225_s4 = sand.u32 1, %s1066_s13  }
  0x26   : > { %s743_s28 = sshll.u32 %s1225_s4, 2  ;;  %s225_s22 = scalar_lea.sflag [#allocation6], %s224_s21 }
  0x27   : > { %s1228_s10 = scalar_lea.vmem [#allocation5], %s743_s28 }
  0x28   : > { %1053 = dma.done.wait (%p1200_p1), %s225_s22, 192  }
  0x29   : > { %1055 = vsyncadd (%p1200_p1), %s225_s22, 4294967104  ;;  %s744_s19 = sshll.u32 %s1225_s4, 3  ;;  %v812_v1 = vld [vmem:[#allocation2] sm:$0xff]  ;;  %v818_v2 = vld [vmem:[#allocation2 + $0x30] sm:$0xff]  ;;  %vm335_vm0 = vcmask 130048   ;;  %s745_s18 = sshll.u32 %s1225_s4, 6 }
  0x2a   : > { %s238_s29 = scalar_lea.vmem [#allocation7], %s744_s19  ;;  %v816_v3 = vld [vmem:[#allocation2 + $0x20] sm:$0xff]  ;;  %v817_v4 = vld [vmem:[#allocation2 + $0x28] sm:$0xff]  ;;  %v819_v6 = vld [vmem:[#allocation2 + $0x38] sm:$0xff]  ;;  %s266_s5 = scalar_lea.vmem [#allocation8], %s745_s18 }
  0x2b   : > { %v811_v0 = vld [vmem:[%s238_s29] sm:$0xff]  ;;  %v815_v8 = vld [vmem:[#allocation2 + $0x18] sm:$0xff]  ;;  %v270_v21 = vld [vmem:[%s1228_s10] sm:$0xf]  ;;  %s820_s27 = sshll.u32 %s1074_s15, 6  ;;  %s610_s9 = sshll.u32 %s266_s5, 4  ;;  %s611_s9 = int_to_ptr.vmem [resolvable:$true] %s610_s9 }
  0x2c   : > { %367 = vmatpush.bf16.msra.mxu0 %v811_v0  ;;  %823 = vmatpush.bf16.msra.mxu3 %v811_v0  ;;  %v813_v5 = vld [vmem:[#allocation2 + $0x8] sm:$0xff]  ;;  %v814_v7 = vld [vmem:[#allocation2 + $0x10] sm:$0xff]  ;;  %s609_s8 = scalar_lea.hbm %s1293_s3, %s820_s27  ;;  %s596_s23 = scalar_lea.sflag [#allocation4], %s1225_s4 }
  0x2d   : > { %821 = vmatpush.bf16.msra.mxu1 %v811_v0  ;;  %822 = vmatpush.bf16.msra.mxu2 %v811_v0  ;;  %s612_s11 = sshll.u32 %s609_s8, 4  ;;  %s1016_s22 = scalar_lea.hbm %s1293_s3, 256  ;;  %s613_s11 = int_to_ptr.hbm [resolvable:$true] %s612_s11 }
  0x2e   : > { %s1010_s15 = sshra.s32 %s613_s11, 4  ;;  %s1011_s15 = int_to_ptr.hbm [resolvable:$true] %s1010_s15 }
  0x2f   : > { %782 = vmatmul.msk.bf16.vlgmr.msra.gmra.mxu0 %vm335_vm0, %v812_v1  ;;  %788 = vmatmul.msk.bf16.vlgmr.msra.gmra.mxu3 %vm335_vm0, %v818_v2  ;;  %s1012_s30 = scalar_lea.hbm %s1011_s15, 64  ;;  %p1017_p10 = scmp.lt.s32.totalorder %s1011_s15, %s1293_s3 }
  0x30   : > { %786 = vmatmul.msk.bf16.vlgmr.msra.gmra.mxu1 %vm335_vm0, %v816_v3  ;;  %787 = vmatmul.msk.bf16.vlgmr.msra.gmra.mxu2 %vm335_vm0, %v817_v4  ;;  %p1013_p5 = scmp.ne.s32.totalorder %s1011_s15, %s1012_s30  ;;  %p1018_p11 = scmp.lt.s32.totalorder %s1016_s22, %s1012_s30 }
  0x32   : > { %p1014_p6 = pnand %p1013_p5, %p1159_p8  ;;  %p1019_p12 = por %p1018_p11, %p1017_p10 }
  0x34   : > { %p1015_p7 = pneg %p1014_p6 }
  0x36   : > { %p1020_p13 = pnand %p1019_p12, %p1015_p7 }
  0x3f   : > { %783 = vmatmul.msk.bf16.gmra.mxu0 %vm335_vm0, %v813_v5  ;;  %789 = vmatmul.msk.bf16.gmra.mxu3 %vm335_vm0, %v819_v6 }
  0x4f   : > { %784 = vmatmul.msk.bf16.gmra.mxu0 %vm335_vm0, %v814_v7 }
  0x5f   : > { %785 = vmatmul.msk.bf16.gmra.mxu0 %vm335_vm0, %v815_v8 }
  0xac   : > { %v369_v9 = vpop.f32.mrf.mxu0 }
  0xad   : > { %v409_v11 = vpack.c.bf16 %v369_v9, %v369_v9  ;;  %v389_v12 = vpop.f32.mrf.mxu1 }
  0xae   : > { %v417_v22 = vpack.c.bf16 %v389_v12, %v389_v12 }
  0xaf   : > { %v427_v15 = vunpack.c.l.b16 %v409_v11 }
  0xb0   : > { %v513_v28 = vunpack.c.l.b16 %v417_v22 }
  0xb2   : > { %v399_v10 = vpop.f32.mrf.mxu3 }
  0xb3   : > { %v394_v26 = vpop.f32.mrf.mxu2  ;;  %v421_v55 = vpack.c.bf16 %v399_v10, %v399_v10 }
  0xb4   : > { %v371_v13 = vpop.f32.mrf.mxu0  ;;  %v419_v43 = vpack.c.bf16 %v394_v26, %v394_v26 }
  0xb5   : > { %v410_v14 = vpack.c.bf16 %v371_v13, %v371_v13  ;;  %v391_v20 = vpop.f32.mrf.mxu1  ;;  %v555_v60 = vunpack.c.l.b16 %v421_v55 }
  0xb6   : > { %v418_v23 = vpack.c.bf16 %v391_v20, %v391_v20  ;;  %v534_v47 = vunpack.c.l.b16 %v419_v43 }
  0xb7   : > { %v428_v16 = vunpack.c.l.b16 %v410_v14 }
  0xb8   : > { %v514_v29 = vunpack.c.l.b16 %v418_v23 }
  0xb9   : > { %v429_v17 = vpack.c.b16 %v428_v16, %v427_v15 }
  0xba   : > { %v401_v18 = vpop.f32.mrf.mxu3  ;;  %v515_v34 = vpack.c.b16 %v514_v29, %v513_v28 }
  0xbb   : > { %441 = vmatpush.bf16.msrb.mxu1 %v429_v17  ;;  %v396_v40 = vpop.f32.mrf.mxu2  ;;  %v422_v56 = vpack.c.bf16 %v401_v18, %v401_v18 }
  0xbc   : > { %v374_v19 = vpop.f32.mrf.mxu0  ;;  %v420_v44 = vpack.c.bf16 %v396_v40, %v396_v40 }
  0xbd   : > { %v411_v25 = vpack.c.bf16 %v374_v19, %v374_v19  ;;  %v556_v61 = vunpack.c.l.b16 %v422_v56 }
  0xbe   : > { %790 = vmatmul.msk.bf16.vlgmr.msrb.gmra.mxu1 %vm335_vm0, %v270_v21  ;;  %v535_v48 = vunpack.c.l.b16 %v420_v44 }
  0xbf   : > { %v450_v31 = vunpack.c.l.b16 %v411_v25  ;;  %v557_v1 = vpack.c.b16 %v556_v61, %v555_v60 }
  0xc0   : > { %v536_v52 = vpack.c.b16 %v535_v48, %v534_v47 }
  0xc2   : > { %v404_v24 = vpop.f32.mrf.mxu3 }
  0xc3   : > { %v423_v33 = vpack.c.bf16 %v404_v24, %v404_v24 }
  0xc4   : > { %v376_v27 = vpop.f32.mrf.mxu0 }
  0xc5   : > { %v412_v30 = vpack.c.bf16 %v376_v27, %v376_v27  ;;  %v576_v37 = vunpack.c.l.b16 %v423_v33 }
  0xc7   : > { %v451_v32 = vunpack.c.l.b16 %v412_v30 }
  0xc9   : > { %v452_v35 = vpack.c.b16 %v451_v32, %v450_v31 }
  0xca   : > { %v406_v36 = vpop.f32.mrf.mxu3 }
  0xcb   : > { %461 = vmatpush.bf16.msrb.mxu2 %v452_v35  ;;  %v424_v38 = vpack.c.bf16 %v406_v36, %v406_v36 }
  0xcc   : > { %v379_v39 = vpop.f32.mrf.mxu0 }
  0xcd   : > { %v577_v41 = vunpack.c.l.b16 %v424_v38  ;;  %v413_v45 = vpack.c.bf16 %v379_v39, %v379_v39 }
  0xce   : > { %791 = vmatmul.msk.bf16.vlgmr.msrb.gmra.mxu2 %vm335_vm0, %v270_v21 }
  0xcf   : > { %524 = vmatpush.bf16.msra.mxu2 %v515_v34  ;;  %v578_v42 = vpack.c.b16 %v577_v41, %v576_v37  ;;  %v471_v50 = vunpack.c.l.b16 %v413_v45 }
  0xd3   : > { %587 = vmatpush.bf16.msrb.mxu2 %v578_v42 }
  0xd4   : > { %v381_v46 = vpop.f32.mrf.mxu0 }
  0xd5   : > { %v414_v49 = vpack.c.bf16 %v381_v46, %v381_v46 }
  0xd7   : > { %v472_v51 = vunpack.c.l.b16 %v414_v49 }
  0xd9   : > { %v473_v53 = vpack.c.b16 %v472_v51, %v471_v50 }
  0xdb   : > { %482 = vmatpush.bf16.msrb.mxu3 %v473_v53 }
  0xdc   : > { %v384_v54 = vpop.f32.mrf.mxu0 }
  0xdd   : > { %v415_v57 = vpack.c.bf16 %v384_v54, %v384_v54 }
  0xde   : > { %793 = vmatmul.msk.bf16.vlgmr.msrb.gmra.mxu3 %vm335_vm0, %v270_v21  ;;  %797 = vmatmul.msk.bf16.vlgmr.msra.gmra.mxu2 %vm335_vm0, %v270_v21 }
  0xdf   : > { %545 = vmatpush.bf16.msra.mxu3 %v536_v52  ;;  %v492_v62 = vunpack.c.l.b16 %v415_v57 }
  0xe4   : > { %v386_v58 = vpop.f32.mrf.mxu0 }
  0xe5   : > { %v416_v59 = vpack.c.bf16 %v386_v58, %v386_v58 }
  0xe7   : > { %v493_v63 = vunpack.c.l.b16 %v416_v59 }
  0xe9   : > { %v494_v0 = vpack.c.b16 %v493_v63, %v492_v62 }
  0xeb   : > { %503 = vmatpush.bf16.msra.mxu1 %v494_v0 }
  0xee   : > { %795 = vmatmul.msk.bf16.vlgmr.msra.gmra.mxu1 %vm335_vm0, %v270_v21  ;;  %799 = vmatmul.msk.bf16.vlgmr.msra.gmra.mxu3 %vm335_vm0, %v270_v21 }
  0xef   : > { %566 = vmatpush.bf16.msrb.mxu1 %v557_v1  ;;  %803 = vmatmul.msk.bf16.vlgmr.msrb.gmra.mxu2 %vm335_vm0, %v270_v21 }
  0xfe   : > { %801 = vmatmul.msk.bf16.vlgmr.msrb.gmra.mxu1 %vm335_vm0, %v270_v21 }
 0x13b   : > { %v443_v2 = vpop.f32.mrf.mxu1 }
 0x13c   : > { %447 = vst [vmem:[%s266_s5] sm:$0xff] %v443_v2 }
 0x143   : > { %v445_v3 = vpop.f32.mrf.mxu1 }
 0x151   : > { %v463_v4 = vpop.f32.mrf.mxu2 }
 0x152   : > { %792 = vst [vmem:[%s266_s5 + $0x8] sm:$0xff] %v463_v4 }
 0x159   : > { %v465_v5 = vpop.f32.mrf.mxu2 }
 0x161   : > { %v484_v6 = vpop.f32.mrf.mxu3  ;;  %v526_v7 = vpop.f32.mrf.mxu2 }
 0x162   : > { %794 = vst [vmem:[%s266_s5 + $0x10] sm:$0xff] %v484_v6 }
 0x163   : > { %798 = vst [vmem:[%s266_s5 + $0x20] sm:$0xff] %v526_v7 }
 0x169   : > { %v486_v8 = vpop.f32.mrf.mxu3  ;;  %v528_v9 = vpop.f32.mrf.mxu2 }
 0x16b   : > { %v505_v10 = vpop.f32.mrf.mxu1 }
 0x16c   : > { %796 = vst [vmem:[%s266_s5 + $0x18] sm:$0xff] %v505_v10 }
 0x171   : > { %v547_v11 = vpop.f32.mrf.mxu3 }
 0x172   : > { %800 = vst [vmem:[%s266_s5 + $0x28] sm:$0xff] %v547_v11  ;;  %v589_v12 = vpop.f32.mrf.mxu2 }
 0x173   : > { %v507_v13 = vpop.f32.mrf.mxu1  ;;  %804 = vst [vmem:[%s266_s5 + $0x38] sm:$0xff] %v589_v12 }
 0x179   : > { %v549_v14 = vpop.f32.mrf.mxu3 }
 0x17a   : > { %v591_v15 = vpop.f32.mrf.mxu2 }
 0x17b   : > { %v568_v16 = vpop.f32.mrf.mxu1 }
 0x17c   : > { %802 = vst [vmem:[%s266_s5 + $0x30] sm:$0xff] %v568_v16 }
 0x17d   : > { %1023 = shalt.err (!%p1020_p13)
}
 0x17e   : > { %s1087_s4 = smov 128   ;;  %s1088_s29 = smov 8  }
 0x17f   : > { %832 = dma.vmem_to_hbm [thread:$0]  (%p1159_p8), %s611_s9, 1024, %s613_s11, %s596_s23, %s1087_s4, %s1087_s4, %s1088_s29  }
 0x183   : > { %v570_v17 = vpop.f32.mrf.mxu1 }
 0x184 PF: > { %p852_p0 = scmp.ge.s32.totalorder %s1082_s17, 2  ;;  %s627_s18 = sand.u32 1, %s1062_s12  }
 0x185   : > { %s628_s5 = scalar_lea.sflag [#allocation4], %s627_s18 }
 0x186   : > { %p846_p1 = pnand %p852_p0, %p1166_p9 }
 0x188   : > { %p847_p2 = pneg %p846_p1 }
 0x18a   : > { %1057 = dma.done.wait (%p847_p2), %s628_s5, 1024  }
 0x18b   : > { %1059 = vsyncadd (%p847_p2), %s628_s5, 4294966272  ;;  %s20_s17 = sadd.s32 1, %s1082_s17   ;;  %s1300_s12 = smov %s1066_s13 }
 0x18c   : > { %p17_p4 = scmp.ge.s32.totalorder %s20_s17, 6   ;;  %s1301_s13 = smov %s1070_s14 }
 0x18d   : > { %s1302_s14 = smov %s1171_s26  ;;  %s1303_s15 = smov %s1078_s16 }
 0x18e   : > { %s1304_s16 = smov %s1306_s20  ;;  %19 = sbr.rel (!%p17_p4) target bundleno = 7 (0x7), region = 101 }
 0x193   :  { %634 = vsyncpa [#allocation3], 1 }
 0x194   :  { %636 = vsyncpa [#allocation3 + $0x1], 1 }
 0x195   :  { %637 = vsyncpa [#allocation6], 1 }
 0x196   :  { %639 = vsyncpa [#allocation6 + $0x1], 1 }
 0x197   :  { %640 = vsyncpa [#allocation4], 1 }
 0x198   :  { %642 = vsyncpa [#allocation4 + $0x1], 1 }

</bundles_post_ra>
